<compile_context>
chip_gen: v7x
topology: tpu7x:2x2x1
jax: 0.10.0
libtpu: 0.0.40
codegen_flags: <defaults>
</compile_context>

<pallas_src>
import jax
import jax.numpy as jnp
from jax.experimental import pallas as pl
from jax.experimental.pallas import tpu as pltpu


# ----------------------------------------------------------------------------
# PE table construction (deterministic "parameter" setup, plain JAX)
# ----------------------------------------------------------------------------
def make_position_encoding_table(max_length: int, embedding_dim: int) -> jnp.ndarray:
    """pe with shape (max_length, 1, embedding_dim), float32.

    pe[:, 0, 0::2] = sin(pos / 10000**(2i/d)), pe[:, 0, 1::2] = cos(...)
    (matches the PyTorch __init__; embedding_dim assumed even).
    """
    assert embedding_dim % 2 == 0, "embedding_dim must be even"
    pos = jnp.arange(max_length, dtype=jnp.float32)[:, None]          # (L, 1)
    _2i = jnp.arange(0, embedding_dim, 2, dtype=jnp.float32)          # (d/2,)
    angle = pos / jnp.power(10000.0, _2i / embedding_dim)             # (L, d/2)
    pe = jnp.stack([jnp.sin(angle), jnp.cos(angle)], axis=-1)         # (L, d/2, 2)
    pe = pe.reshape(max_length, embedding_dim)                        # interleaved
    return pe[:, None, :]                                             # (L, 1, d)


# ----------------------------------------------------------------------------
# Tile-size heuristics (byte-budget based, valid for TPU block rules)
# ----------------------------------------------------------------------------
_TARGET_BLOCK_BYTES = 2 * 1024 * 1024   # ~2 MB per block: near HBM roofline on
                                        # v5e/v6e/v7x, safe vs scoped VMEM.


def _choose_batch_tile(n, c, s, itemsize, target_bytes=_TARGET_BLOCK_BYTES,
                       max_unroll=64):
    """Batch tile for the fused NCHW path.

    The output block is (S, tn, C); its second-minor dim (tn) must be a
    multiple of 8 or equal the full batch. Leading dims are unconstrained.
    """
    if n <= 8:
        return n
    per_item = max(c * s * itemsize, 1)
    tn = int(target_bytes // per_item)
    tn = min(tn, max_unroll, n)
    tn = max(8, (tn // 8) * 8)
    if tn >= n:
        # Full batch fits in one block; if the batch is big enough, split it so
        # the grid has >=2 parallel steps (keeps both v7x TensorCores busy and
        # enables DMA/compute overlap).
        tn = max(8, ((n // 2) // 8) * 8) if n >= 16 else n
    return tn


def _choose_seq_tile(s, n, c, itemsize, target_bytes=_TARGET_BLOCK_BYTES):
    """Seq tile for the (S, N, C) path. Leading (seq) block dim is unconstrained;
    non-divisible S is handled by a cdiv grid + masked boundary block."""
    per_row = max(n * c * itemsize, 1)
    ts = int(target_bytes // per_row)
    if ts >= s:
        return s
    if ts > 8:
        ts = (ts // 8) * 8
    return max(1, ts)


# ----------------------------------------------------------------------------
# Kernels
# ----------------------------------------------------------------------------
def _pe_add_fused_kernel(x_ref, pe_ref, o_ref):
    """Fused layout-change + add for NCHW inputs.

    x_ref : (tn, C, S)  native (batch, channel, seq) layout block
    pe_ref: (S, C)      full PE slice, resident in VMEM (constant block index)
    o_ref : (S, tn, C)  block of the module's (seq, batch, channel) output
    """
    pe = pe_ref[...]                                   # hoisted load
    for j in range(x_ref.shape[0]):                    # static unroll (tn <= 64)
        xt = x_ref[j, :, :].T                          # (C, S) -> (S, C), XLU
        o_ref[:, j, :] = xt + pe


def _pe_add_kernel(x_ref, pe_ref, o_ref):
    """Plain broadcast add for inputs already in (S, N, C) layout.

    x_ref: (ts, N, C), pe_ref: (ts, 1, C) -> broadcast over N.
    """
    o_ref[...] = x_ref[...] + pe_ref[...]


# ----------------------------------------------------------------------------
# pallas_call wrappers
# ----------------------------------------------------------------------------
def _fused_nchw_forward(x_ncs, pe_sc):
    """x_ncs: (N, C, S) [free reshape of NCHW], pe_sc: (S, C). Returns (S, N, C)."""
    n, c, s = x_ncs.shape
    tn = _choose_batch_tile(n, c, s, x_ncs.dtype.itemsize)
    grid = (pl.cdiv(n, tn),)
    return pl.pallas_call(
        _pe_add_fused_kernel,
        out_shape=jax.ShapeDtypeStruct((s, n, c), x_ncs.dtype),
        grid_spec=pltpu.PrefetchScalarGridSpec(
            num_scalar_prefetch=0,
            grid=grid,
            in_specs=[
                # x: native layout block; last two dims are full (C, S).
                pl.BlockSpec((tn, c, s), lambda b: (b, 0, 0)),
                # pe: full extent, constant block index -> DMA'd once, resident.
                pl.BlockSpec((s, c), lambda b: (0, 0)),
            ],
            out_specs=pl.BlockSpec((s, tn, c), lambda b: (0, b, 0)),
        ),
        compiler_params=pltpu.CompilerParams(
            dimension_semantics=("parallel",),
        ),
    )(x_ncs, pe_sc)


def _seq_first_forward(x_snc, pe_s1c):
    """x_snc: (S, N, C), pe_s1c: (S, 1, C). Returns (S, N, C)."""
    s, n, c = x_snc.shape
    ts = _choose_seq_tile(s, n, c, x_snc.dtype.itemsize)
    grid = (pl.cdiv(s, ts),)
    return pl.pallas_call(
        _pe_add_kernel,
        out_shape=jax.ShapeDtypeStruct((s, n, c), x_snc.dtype),
        grid_spec=pltpu.PrefetchScalarGridSpec(
            num_scalar_prefetch=0,
            grid=grid,
            in_specs=[
                pl.BlockSpec((ts, n, c), lambda i: (i, 0, 0)),
                pl.BlockSpec((ts, 1, c), lambda i: (i, 0, 0)),
            ],
            out_specs=pl.BlockSpec((ts, n, c), lambda i: (i, 0, 0)),
        ),
        compiler_params=pltpu.CompilerParams(
            dimension_semantics=("parallel",),
        ),
    )(x_snc, pe_s1c)


def position_encoding_forward(x: jnp.ndarray, pe: jnp.ndarray) -> jnp.ndarray:
    """Forward pass of PositionEncoding.

    x : (N, C, H, W) (rearranged like the PyTorch module to (H*W, N, C)), or
        already (S, N, C).
    pe: (max_length, 1, C) float32 table.
    Returns (S, N, C) in x.dtype.
    """
    if x.ndim == 4:
        n, c, h, w = x.shape
        s = h * w
        assert pe.shape[0] >= s, "seq_len exceeds max_length of the PE table"
        assert pe.shape[2] == c
        x_ncs = x.reshape(n, c, s)                    # free view: 'n c h w -> n c (h w)'
        pe_sc = pe[:s, 0, :].astype(x.dtype)          # cast once; tiny
        try:
            return _fused_nchw_forward(x_ncs, pe_sc)
        except Exception:
            # TODO(synk): fused in-kernel transpose not supported on this
            # backend/shape; fall back to an explicit relayout (one extra HBM
            # pass over x) + the plain broadcast-add kernel.
            x = jnp.transpose(x_ncs, (2, 0, 1))       # (S, N, C)

    s, n, c = x.shape
    assert pe.shape[0] >= s, "seq_len exceeds max_length of the PE table"
    assert pe.shape[2] == c
    return _seq_first_forward(x, pe[:s].astype(x.dtype))


# ----------------------------------------------------------------------------
# Pure-JAX reference for correctness check
# ----------------------------------------------------------------------------
def position_encoding_ref(x, pe):
    if x.ndim == 4:
        n, c, h, w = x.shape
        x = jnp.transpose(x, (2, 3, 0, 1)).reshape(h * w, n, c)
    return x + pe[: x.shape[0]]


if __name__ == "__main__":
    key = jax.random.PRNGKey(0)
    k1, k2 = jax.random.split(key)

    # Small shapes consistent with the module's forward:
    # 4D NCHW input, embedding_dim = C = 32, seq_len = H*W = 16 <= max_length = 75
    N, C, H, W = 2, 32, 4, 4
    max_length = 75
    pe = make_position_encoding_table(max_length, C)

    x4 = jax.random.normal(k1, (N, C, H, W), dtype=jnp.float32)
    out4 = jax.block_until_ready(position_encoding_forward(x4, pe))
    ref4 = position_encoding_ref(x4, pe)
    assert out4.shape == (H * W, N, C)
    assert jnp.allclose(out4, ref4, atol=1e-6, rtol=1e-6), "4D path mismatch vs reference"

    # 3D (seq, batch, embed) input path (also supported by the module)
    S3 = 8
    x3 = jax.random.normal(k2, (S3, N, C), dtype=jnp.float32)
    out3 = jax.block_until_ready(position_encoding_forward(x3, pe))
    ref3 = position_encoding_ref(x3, pe)
    assert out3.shape == (S3, N, C)
    assert jnp.allclose(out3, ref3, atol=1e-6, rtol=1e-6), "3D path mismatch vs reference"

    print("KERNEL_OK")
</pallas_src>

<mosaic_0001>
module attributes {stable_mosaic.version = 11 : i64} {
  func.func @_pe_add_fused_kernel(%arg0: i32, %arg1: memref<2x32x16xf32, #tpu.memory_space<vmem>>, %arg2: memref<16x32xf32, #tpu.memory_space<vmem>>, %arg3: memref<16x2x32xf32, #tpu.memory_space<vmem>>) attributes {dimension_semantics = [#tpu.dimension_semantics<parallel>], iteration_bounds = array<i64: 1>, scalar_prefetch = 0 : i64, scratch_operands = 0 : i64, tpu.core_type = #tpu.core_type<tc>, window_params = [{transform_indices = @transform_0, window_bounds = array<i64: 2, 32, 16>}, {pipeline_mode = #tpu.pipeline_mode<synchronous>, transform_indices = @transform_1, window_bounds = array<i64: 16, 32>}, {transform_indices = @transform_2, window_bounds = array<i64: 16, 2, 32>}]} {
    %c0 = arith.constant 0 : index
    %c0_0 = arith.constant 0 : index
    %0 = vector.load %arg2[%c0, %c0_0] : memref<16x32xf32, #tpu.memory_space<vmem>>, vector<16x32xf32>
    %c0_1 = arith.constant 0 : index
    %c0_2 = arith.constant 0 : index
    %c0_3 = arith.constant 0 : index
    %1 = vector.load %arg1[%c0_1, %c0_2, %c0_3] : memref<2x32x16xf32, #tpu.memory_space<vmem>>, vector<1x32x16xf32>
    %2 = vector.shape_cast %1 : vector<1x32x16xf32> to vector<32x16xf32>
    %3 = tpu.transpose %2, [1, 0] : vector<32x16xf32> -> vector<16x32xf32>
    %4 = arith.addf %3, %0 : vector<16x32xf32>
    %c0_4 = arith.constant 0 : index
    %c0_5 = arith.constant 0 : index
    %c0_6 = arith.constant 0 : index
    %5 = vector.load %arg3[%c0_4, %c0_5, %c0_6] : memref<16x2x32xf32, #tpu.memory_space<vmem>>, vector<16x1x32xf32>
    %6 = vector.shape_cast %5 : vector<16x1x32xf32> to vector<16x32xf32>
    %7 = vector.shape_cast %4 : vector<16x32xf32> to vector<16x1x32xf32>
    tpu.vector_store %arg3[%c0_4, %c0_5, %c0_6], %7 {strides = array<i32>} : memref<16x2x32xf32, #tpu.memory_space<vmem>>, vector<16x1x32xf32>,
    %c1 = arith.constant 1 : index
    %c0_7 = arith.constant 0 : index
    %c0_8 = arith.constant 0 : index
    %8 = vector.load %arg1[%c1, %c0_7, %c0_8] : memref<2x32x16xf32, #tpu.memory_space<vmem>>, vector<1x32x16xf32>
    %9 = vector.shape_cast %8 : vector<1x32x16xf32> to vector<32x16xf32>
    %10 = tpu.transpose %9, [1, 0] : vector<32x16xf32> -> vector<16x32xf32>
    %11 = arith.addf %10, %0 : vector<16x32xf32>
    %c0_9 = arith.constant 0 : index
    %c1_10 = arith.constant 1 : index
    %c0_11 = arith.constant 0 : index
    %12 = vector.load %arg3[%c0_9, %c1_10, %c0_11] : memref<16x2x32xf32, #tpu.memory_space<vmem>>, vector<16x1x32xf32>
    %13 = vector.shape_cast %12 : vector<16x1x32xf32> to vector<16x32xf32>
    %14 = vector.shape_cast %11 : vector<16x32xf32> to vector<16x1x32xf32>
    tpu.vector_store %arg3[%c0_9, %c1_10, %c0_11], %14 {strides = array<i32>} : memref<16x2x32xf32, #tpu.memory_space<vmem>>, vector<16x1x32xf32>,
    return
  }
  func.func @transform_0(%arg0: i32) -> (i32, i32, i32) {
    %c0_i32 = arith.constant 0 : i32
    %c0_i32_0 = arith.constant 0 : i32
    %c0_i32_1 = arith.constant 0 : i32
    return %arg0, %c0_i32, %c0_i32_0 : i32, i32, i32
  }
  func.func @transform_1(%arg0: i32) -> (i32, i32) {
    %c0_i32 = arith.constant 0 : i32
    %c0_i32_0 = arith.constant 0 : i32
    %c0_i32_1 = arith.constant 0 : i32
    return %c0_i32, %c0_i32_0 : i32, i32
  }
  func.func @transform_2(%arg0: i32) -> (i32, i32, i32) {
    %c0_i32 = arith.constant 0 : i32
    %c0_i32_0 = arith.constant 0 : i32
    %c0_i32_1 = arith.constant 0 : i32
    return %c0_i32, %arg0, %c0_i32_0 : i32, i32, i32
  }
}

module attributes {stable_mosaic.version = 11 : i64} {
  func.func @_pe_add_kernel(%arg0: i32, %arg1: memref<16x2x32xf32, #tpu.memory_space<vmem>>, %arg2: memref<16x1x32xf32, #tpu.memory_space<vmem>>, %arg3: memref<16x2x32xf32, #tpu.memory_space<vmem>>) attributes {dimension_semantics = [#tpu.dimension_semantics<parallel>], iteration_bounds = array<i64: 1>, scalar_prefetch = 0 : i64, scratch_operands = 0 : i64, tpu.core_type = #tpu.core_type<tc>, window_params = [{transform_indices = @transform_0, window_bounds = array<i64: 16, 2, 32>}, {transform_indices = @transform_1, window_bounds = array<i64: 16, 1, 32>}, {transform_indices = @transform_2, window_bounds = array<i64: 16, 2, 32>}]} {
    %c0 = arith.constant 0 : index
    %c0_0 = arith.constant 0 : index
    %c0_1 = arith.constant 0 : index
    %0 = vector.load %arg1[%c0, %c0_0, %c0_1] : memref<16x2x32xf32, #tpu.memory_space<vmem>>, vector<16x2x32xf32>
    %c0_2 = arith.constant 0 : index
    %c0_3 = arith.constant 0 : index
    %c0_4 = arith.constant 0 : index
    %1 = vector.load %arg2[%c0_2, %c0_3, %c0_4] : memref<16x1x32xf32, #tpu.memory_space<vmem>>, vector<16x1x32xf32>
    %2 = vector.broadcast %1 : vector<16x1x32xf32> to vector<16x2x32xf32>
    %3 = arith.addf %0, %2 : vector<16x2x32xf32>
    %c0_5 = arith.constant 0 : index
    %c0_6 = arith.constant 0 : index
    %c0_7 = arith.constant 0 : index
    %4 = vector.load %arg3[%c0_5, %c0_6, %c0_7] : memref<16x2x32xf32, #tpu.memory_space<vmem>>, vector<16x2x32xf32>
    tpu.vector_store %arg3[%c0_5, %c0_6, %c0_7], %3 {strides = array<i32>} : memref<16x2x32xf32, #tpu.memory_space<vmem>>, vector<16x2x32xf32>,
    return
  }
  func.func @transform_0(%arg0: i32) -> (i32, i32, i32) {
    %c0_i32 = arith.constant 0 : i32
    %c0_i32_0 = arith.constant 0 : i32
    %c0_i32_1 = arith.constant 0 : i32
    return %arg0, %c0_i32, %c0_i32_0 : i32, i32, i32
  }
  func.func @transform_1(%arg0: i32) -> (i32, i32, i32) {
    %c0_i32 = arith.constant 0 : i32
    %c0_i32_0 = arith.constant 0 : i32
    %c0_i32_1 = arith.constant 0 : i32
    return %arg0, %c0_i32, %c0_i32_0 : i32, i32, i32
  }
  func.func @transform_2(%arg0: i32) -> (i32, i32, i32) {
    %c0_i32 = arith.constant 0 : i32
    %c0_i32_0 = arith.constant 0 : i32
    %c0_i32_1 = arith.constant 0 : i32
    return %arg0, %c0_i32, %c0_i32_0 : i32, i32, i32
  }
}

</mosaic_0001>

<bundles_post_ra>
// kernel: tpu_custom_call.1
= control target key start
LH: loop header
LB: loop body
LE: loop exit
PB: predicated region body
PF: predicated region fallthrough
CT: control target
= control target key end

     0   :  { %s524_s0 = inlined_call_operand.vmem [shape: f32[2,32,16], index: 0, kind: input, shape index: {}]   ;;  %s525_s1 = inlined_call_operand.vmem [shape: f32[16,32], index: 1, kind: input, shape index: {}]   ;;  %s526_s2 = inlined_call_operand.hbm [shape: f32[16,2,32], index: 2, kind: output, shape index: {}]  }
   0x1   :  { %v372_v0 = vld [vmem:[%s524_s0 + $0x20] sm:$0xff]  ;;  %v373_v2 = vld [vmem:[%s524_s0 + $0x28] sm:$0xff] }
   0x2   :  { %v14_v1 = vld [vmem:[%s524_s0] sm:$0xff]  ;;  %190 = vxpose.xlu1.b32.start [1/4] (short) (narrow) %v372_v0, 16  ;;  %v15_v3 = vld [vmem:[%s524_s0 + $0x8] sm:$0xff] }
   0x3   :  { %18 = vxpose.xlu0.b32.start [1/4] (short) (narrow) %v14_v1, 16 }
   0x4   :  { %7 = vsyncpa [#allocation3], 0  ;;  %v374_v4 = vld [vmem:[%s524_s0 + $0x30] sm:$0xff]  ;;  %v375_v6 = vld [vmem:[%s524_s0 + $0x38] sm:$0xff]  ;;  %v405_v8 = vmov 1966171168   ;;  %v58_v10 = vlaneseq }
   0x5   :  { %v16_v5 = vld [vmem:[%s524_s0 + $0x10] sm:$0xff]  ;;  %v17_v7 = vld [vmem:[%s524_s0 + $0x18] sm:$0xff]  ;;  %v56_v9 = vunpack.c.l.s4 %v405_v8  ;;  %v12_v13 = vld [vmem:[%s525_s1] sm:$0xff]  ;;  %vm168_vm0 = vcmask 253952  }
   0x6   :  { %191 = vxpose.xlu1.b32.cont [2/4] (short) (narrow) %v373_v2, 16  ;;  %v59_v12 = vshrl.u32 %v58_v10, 7  ;;  %v13_v23 = vld [vmem:[%s525_s1 + $0x8] sm:$0xff]  ;;  %s406_s1 = smov [#allocation2]  }
   0x7   :  { %19 = vxpose.xlu0.b32.cont [2/4] (short) (narrow) %v15_v3, 16  ;;  %v57_v11 = vunpack.c.0.s8 %v56_v9  ;;  %s361_s28 = sshll.u32 %s406_s1, 4  ;;  %s362_s28 = int_to_ptr.vmem [resolvable:$true] %s361_s28 }
   0x8   :  { %s381_s29 = scalar_lea.vmem %s362_s28, 512  ;;  %p386_p1 = scmp.lt.s32.totalorder %s362_s28, %s362_s28 }
   0x9   :  { %v451_v14 = vsub.s32 %v57_v11, %v59_v12  ;;  %p382_p0 = scmp.ne.s32.totalorder %s362_s28, %s381_s29  ;;  %p387_p2 = scmp.lt.s32.totalorder %s381_s29, %s381_s29 }
   0xa   :  { %192 = vxpose.xlu1.b32.cont [3/4] (short) (narrow) %v374_v4, 16 }
   0xb   :  { %20 = vxpose.xlu0.b32.cont [3/4] (short) (narrow) %v16_v5, 16  ;;  %p388_p3 = por %p387_p2, %p386_p1 }
   0xd   :  { %p389_p4 = pnand %p388_p3, %p382_p0 }
   0xe   :  { %193 = vxpose.xlu1.b32.end [4/4] (short) (narrow) %v375_v6, 16 }
   0xf   :  { %21 = vxpose.xlu0.b32.end [4/4] (short) (narrow) %v17_v7, 16 }
  0x82   :  { %v206_v15 = vpop.trf.xlu1 }
  0x83   :  { %v34_v16 = vpop.trf.xlu0  ;;  %v222_v17 = vadd.f32 %v206_v15, %v12_v13 }
  0x84   :  { %v50_v18 = vadd.f32 %v34_v16, %v12_v13 }
  0x85   :  { %v226_v19 = vcombine.high %v222_v17, %v222_v17  ;;  %v233_v20 = vrot.slane %v222_v17, %v451_v14 }
  0x86   :  { %v54_v21 = vcombine.high %v50_v18, %v50_v18  ;;  %v61_v22 = vrot.slane %v50_v18, %v451_v14  ;;  %v207_v24 = vpop.trf.xlu1 }
  0x87   :  { %v35_v25 = vpop.trf.xlu0  ;;  %v240_v26 = vrot.slane %v226_v19, %v451_v14  ;;  %v241_v27 = vcombine.high %v233_v20, %v233_v20  ;;  %v249_v28 = vrot.slane %v233_v20, %v451_v14  ;;  %v223_v32 = vadd.f32 %v207_v24, %v13_v23 }
  0x88   :  { %v68_v29 = vrot.slane %v54_v21, %v451_v14  ;;  %v69_v30 = vcombine.high %v61_v22, %v61_v22  ;;  %v77_v31 = vrot.slane %v61_v22, %v451_v14  ;;  %v51_v33 = vadd.f32 %v35_v25, %v13_v23 }
  0x89   :  { %v242_v34 = vcombine.high %v240_v26, %v240_v26  ;;  %v256_v35 = vrot.slane %v240_v26, %v451_v14  ;;  %v263_v36 = vrot.slane %v241_v27, %v451_v14  ;;  %v271_v37 = vcombine.high %v249_v28, %v249_v28  ;;  %340 = vst.msk [vmem:[#allocation2 + $0x1] sm:$0x1] %vm168_vm0, %v249_v28 }
  0x8a   :  { %v70_v38 = vcombine.high %v68_v29, %v68_v29  ;;  %v84_v39 = vrot.slane %v68_v29, %v451_v14  ;;  %v91_v40 = vrot.slane %v69_v30, %v451_v14  ;;  %v99_v41 = vcombine.high %v77_v31, %v77_v31  ;;  %169 = vst.msk [vmem:[#allocation2] sm:$0x1] %vm168_vm0, %v77_v31 }
  0x8b   :  { %v270_v42 = vrot.slane %v242_v34, %v451_v14  ;;  %v272_v43 = vcombine.high %v256_v35, %v256_v35  ;;  %v273_v44 = vcombine.high %v263_v36, %v263_v36  ;;  %341 = vst.msk [vmem:[#allocation2 + $0x3] sm:$0x1] %vm168_vm0, %v263_v36  ;;  %342 = vst.msk [vmem:[#allocation2 + $0x5] sm:$0x1] %vm168_vm0, %v271_v37 }
  0x8c   :  { %344 = vst.msk [vmem:[#allocation2 + $0x9] sm:$0x1] %vm168_vm0, %v256_v35  ;;  %v275_v45 = vcombine.high %v223_v32, %v223_v32  ;;  %v98_v46 = vrot.slane %v70_v38, %v451_v14  ;;  %v100_v47 = vcombine.high %v84_v39, %v84_v39  ;;  %v101_v48 = vcombine.high %v91_v40, %v91_v40 }
  0x8d   :  { %170 = vst.msk [vmem:[#allocation2 + $0x2] sm:$0x1] %vm168_vm0, %v91_v40  ;;  %171 = vst.msk [vmem:[#allocation2 + $0x4] sm:$0x1] %vm168_vm0, %v99_v41  ;;  %v282_v49 = vrot.slane %v223_v32, %v451_v14  ;;  %v274_v50 = vcombine.high %v270_v42, %v270_v42  ;;  %v103_v52 = vcombine.high %v51_v33, %v51_v33 }
  0x8e   :  { %173 = vst.msk [vmem:[#allocation2 + $0x8] sm:$0x1] %vm168_vm0, %v84_v39  ;;  %343 = vst.msk [vmem:[#allocation2 + $0x7] sm:$0x1] %vm168_vm0, %v273_v44  ;;  %v289_v51 = vrot.slane %v275_v45, %v451_v14  ;;  %v110_v53 = vrot.slane %v51_v33, %v451_v14  ;;  %v102_v54 = vcombine.high %v98_v46, %v98_v46 }
  0x8f   :  { %345 = vst.msk [vmem:[#allocation2 + $0xb] sm:$0x1] %vm168_vm0, %v270_v42  ;;  %346 = vst.msk [vmem:[#allocation2 + $0xd] sm:$0x1] %vm168_vm0, %v272_v43  ;;  %v290_v55 = vcombine.high %v282_v49, %v282_v49  ;;  %v298_v56 = vrot.slane %v282_v49, %v451_v14  ;;  %v117_v59 = vrot.slane %v103_v52, %v451_v14 }
  0x90   :  { %172 = vst.msk [vmem:[#allocation2 + $0x6] sm:$0x1] %vm168_vm0, %v101_v48  ;;  %174 = vst.msk [vmem:[#allocation2 + $0xa] sm:$0x1] %vm168_vm0, %v98_v46  ;;  %v291_v57 = vcombine.high %v289_v51, %v289_v51  ;;  %v305_v58 = vrot.slane %v289_v51, %v451_v14  ;;  %v118_v60 = vcombine.high %v110_v53, %v110_v53 }
  0x91   :  { %175 = vst.msk [vmem:[#allocation2 + $0xc] sm:$0x1] %vm168_vm0, %v100_v47  ;;  %347 = vst.msk [vmem:[#allocation2 + $0xf] sm:$0x1] %vm168_vm0, %v274_v50  ;;  %v312_v61 = vrot.slane %v290_v55, %v451_v14  ;;  %v320_v62 = vcombine.high %v298_v56, %v298_v56  ;;  %v126_v63 = vrot.slane %v110_v53, %v451_v14 }
  0x92   :  { %176 = vst.msk [vmem:[#allocation2 + $0xe] sm:$0x1] %vm168_vm0, %v102_v54  ;;  %348 = vst.msk [vmem:[#allocation2 + $0x11] sm:$0x1] %vm168_vm0, %v298_v56  ;;  %v319_v0 = vrot.slane %v291_v57, %v451_v14  ;;  %v321_v1 = vcombine.high %v305_v58, %v305_v58  ;;  %v119_v2 = vcombine.high %v117_v59, %v117_v59 }
  0x93   :  { %352 = vst.msk [vmem:[#allocation2 + $0x19] sm:$0x1] %vm168_vm0, %v305_v58  ;;  %v133_v3 = vrot.slane %v117_v59, %v451_v14  ;;  %v322_v4 = vcombine.high %v312_v61, %v312_v61  ;;  %349 = vst.msk [vmem:[#allocation2 + $0x13] sm:$0x1] %vm168_vm0, %v312_v61  ;;  %v140_v5 = vrot.slane %v118_v60, %v451_v14 }
  0x94   :  { %350 = vst.msk [vmem:[#allocation2 + $0x15] sm:$0x1] %vm168_vm0, %v320_v62  ;;  %v148_v6 = vcombine.high %v126_v63, %v126_v63  ;;  %177 = vst.msk [vmem:[#allocation2 + $0x10] sm:$0x1] %vm168_vm0, %v126_v63  ;;  %v323_v7 = vcombine.high %v319_v0, %v319_v0  ;;  %v147_v8 = vrot.slane %v119_v2, %v451_v14 }
  0x95   :  { %353 = vst.msk [vmem:[#allocation2 + $0x1b] sm:$0x1] %vm168_vm0, %v319_v0  ;;  %354 = vst.msk [vmem:[#allocation2 + $0x1d] sm:$0x1] %vm168_vm0, %v321_v1  ;;  %v149_v9 = vcombine.high %v133_v3, %v133_v3  ;;  %v150_v10 = vcombine.high %v140_v5, %v140_v5 }
  0x96   :  { %181 = vst.msk [vmem:[#allocation2 + $0x18] sm:$0x1] %vm168_vm0, %v133_v3  ;;  %351 = vst.msk [vmem:[#allocation2 + $0x17] sm:$0x1] %vm168_vm0, %v322_v4  ;;  %v151_v11 = vcombine.high %v147_v8, %v147_v8 }
  0x97   :  { %178 = vst.msk [vmem:[#allocation2 + $0x12] sm:$0x1] %vm168_vm0, %v140_v5  ;;  %179 = vst.msk [vmem:[#allocation2 + $0x14] sm:$0x1] %vm168_vm0, %v148_v6 }
  0x98   :  { %355 = vst.msk [vmem:[#allocation2 + $0x1f] sm:$0x1] %vm168_vm0, %v323_v7  ;;  %182 = vst.msk [vmem:[#allocation2 + $0x1a] sm:$0x1] %vm168_vm0, %v147_v8 }
  0x99   :  { %183 = vst.msk [vmem:[#allocation2 + $0x1c] sm:$0x1] %vm168_vm0, %v149_v9  ;;  %180 = vst.msk [vmem:[#allocation2 + $0x16] sm:$0x1] %vm168_vm0, %v150_v10 }
  0x9a   :  { %184 = vst.msk [vmem:[#allocation2 + $0x1e] sm:$0x1] %vm168_vm0, %v151_v11 }
  0x9b   :  { %392 = shalt.err (!%p389_p4)
}
  0x9c   :  { %s393_s4 = scalar_lea.hbm %s526_s2, 512 }
  0x9d   :  { %p394_p5 = scmp.ne.s32.totalorder %s526_s2, %s393_s4  ;;  %p397_p6 = scmp.lt.u32.totalorder %s393_s4, %s526_s2 }
  0x9f   :  { %p399_p7 = pnand %p397_p6, %p394_p5 }
  0xa1   :  { %402 = shalt.err (!%p399_p7)
}
  0xa2   :  { %s407_s9 = smov 32   ;;  %s408_s10 = smov 2  }
  0xa3   :  { %367 = dma.vmem_to_hbm [thread:$0]  %s362_s28, 512, %s526_s2, [#allocation3], %s407_s9, %s407_s9, %s408_s10  }
  0xa4   :  { %403 = dma.done.wait [#allocation3], 512  }
  0xa5   :  { %404 = vsyncadd [#allocation3], 4294966784 }
  0xa6   :  { %371 = vsyncpa [#allocation3], 1 }

// kernel: tpu_custom_call.1
= control target key start
LH: loop header
LB: loop body
LE: loop exit
PB: predicated region body
PF: predicated region fallthrough
CT: control target
= control target key end

     0   :  { %7 = vsyncpa [#allocation3], 0  ;;  %s397_s0 = inlined_call_operand.hbm [shape: f32[16,2,32], index: 0, kind: input, shape index: {}]   ;;  %s398_s1 = inlined_call_operand.hbm [shape: f32[16,1,32], index: 1, kind: input, shape index: {}]   ;;  %s399_s2 = inlined_call_operand.hbm [shape: f32[16,2,32], index: 2, kind: output, shape index: {}]  }
   0x1   :  { %8 = vsyncpa [#allocation6], 0 }
   0x2   :  { %9 = vsyncpa [#allocation4], 0  ;;  %s314_s9 = smov [#allocation2]   ;;  %s242_s13 = scalar_lea.hbm %s397_s0, 512 }
   0x3   :  { %s15_s10 = sshll.u32 %s314_s9, 4  ;;  %p243_p0 = scmp.ne.s32.totalorder %s397_s0, %s242_s13  ;;  %s16_s10 = int_to_ptr.vmem [resolvable:$true] %s15_s10 }
   0x4   :  { %p246_p1 = scmp.lt.u32.totalorder %s242_s13, %s397_s0 }
   0x6   :  { %p248_p2 = pnand %p246_p1, %p243_p0 }
   0x8   :  { %251 = shalt.err (!%p248_p2)
}
   0x9   :  { %s252_s18 = scalar_lea.vmem %s16_s10, 512  ;;  %p257_p4 = scmp.lt.s32.totalorder %s16_s10, %s16_s10 }
   0xa   :  { %p253_p3 = scmp.ne.s32.totalorder %s16_s10, %s252_s18  ;;  %p258_p5 = scmp.lt.s32.totalorder %s252_s18, %s252_s18 }
   0xc   :  { %p259_p6 = por %p258_p5, %p257_p4 }
   0xe   :  { %p260_p7 = pnand %p259_p6, %p253_p3 }
  0x10   :  { %263 = shalt.err (!%p260_p7)
}
  0x11   :  { %s315_s19 = smov 32   ;;  %s316_s20 = smov 2  }
  0x12   :  { %21 = dma.hbm_to_vmem [thread:$0]  %s397_s0, 512, %s16_s10, [#allocation3], %s315_s19, %s315_s19, %s316_s20  }
  0x13   :  { %s317_s23 = smov [#allocation5]   ;;  %s264_s27 = scalar_lea.hbm %s398_s1, 256 }
  0x14   :  { %s27_s24 = sshll.u32 %s317_s23, 4  ;;  %p265_p8 = scmp.ne.s32.totalorder %s398_s1, %s264_s27  ;;  %s28_s24 = int_to_ptr.vmem [resolvable:$true] %s27_s24 }
  0x15   :  { %p268_p9 = scmp.lt.u32.totalorder %s264_s27, %s398_s1 }
  0x17   :  { %p270_p10 = pnand %p268_p9, %p265_p8 }
  0x19   :  { %273 = shalt.err (!%p270_p10)
}
  0x1a   :  { %s274_s4 = scalar_lea.vmem %s28_s24, 256  ;;  %p279_p12 = scmp.lt.s32.totalorder %s28_s24, %s28_s24 }
  0x1b   :  { %p275_p11 = scmp.ne.s32.totalorder %s28_s24, %s274_s4  ;;  %p280_p13 = scmp.lt.s32.totalorder %s274_s4, %s274_s4 }
  0x1d   :  { %p281_p0 = por %p280_p13, %p279_p12 }
  0x1f   :  { %p282_p1 = pnand %p281_p0, %p275_p11 }
  0x21   :  { %285 = shalt.err (!%p282_p1)
}
  0x22   :  { %s318_s0 = smov 16   ;;  %s319_s5 = smov 1  }
  0x23   :  { %33 = dma.hbm_to_vmem [thread:$0]  %s398_s1, 256, %s28_s24, [#allocation6], %s318_s0, %s318_s0, %s319_s5  }
  0x24   :  { %308 = dma.done.wait [#allocation3], 512  }
  0x25   :  { %309 = vsyncadd [#allocation3], 4294966784 }
  0x26   :  { %310 = dma.done.wait [#allocation6], 256  }
  0x27   :  { %311 = vsyncadd [#allocation6], 4294967040  ;;  %vm184_vm0 = vcmask 254976   ;;  %s320_s8 = smov [#allocation7]   ;;  %v40_v0 = vld [vmem:[#allocation2] sm:$0x3] }
  0x28   :  { %s363_s9 = sshll.u32 %s320_s8, 4  ;;  %v219_v1 = vld [vmem:[#allocation5] ss:$0 sm:$0xff]  ;;  %v41_v2 = vld [vmem:[#allocation2 + $0x2] sm:$0x3]  ;;  %s207_s9 = int_to_ptr.vmem [resolvable:$true] %s363_s9 }
  0x29   :  { %v168_v3 = vadd.f32 %v219_v1, %v40_v0  ;;  %v220_v4 = vld [vmem:[#allocation5 + $0x1] ss:$0 sm:$0xff]  ;;  %v42_v5 = vld [vmem:[#allocation2 + $0x4] sm:$0x3]  ;;  %v221_v6 = vld [vmem:[#allocation5 + $0x2] ss:$0 sm:$0xff]  ;;  %p291_p3 = scmp.lt.s32.totalorder %s207_s9, %s207_s9 }
  0x2a   :  { %v169_v7 = vadd.f32 %v220_v4, %v41_v2  ;;  %v170_v8 = vadd.f32 %v221_v6, %v42_v5  ;;  %v43_v9 = vld [vmem:[#allocation2 + $0x6] sm:$0x3]  ;;  %v222_v10 = vld [vmem:[#allocation5 + $0x3] ss:$0 sm:$0xff]  ;;  %v44_v11 = vld [vmem:[#allocation2 + $0x8] sm:$0x3] }
  0x2b   :  { %185 = vst.msk [vmem:[#allocation7] sm:$0x3] %vm184_vm0, %v168_v3  ;;  %v171_v12 = vadd.f32 %v222_v10, %v43_v9  ;;  %v223_v13 = vld [vmem:[#allocation5 + $0x4] ss:$0 sm:$0xff]  ;;  %v45_v14 = vld [vmem:[#allocation2 + $0xa] sm:$0x3] }
  0x2c   :  { %v224_v15 = vld [vmem:[#allocation5 + $0x5] ss:$0 sm:$0xff]  ;;  %186 = vst.msk [vmem:[#allocation7 + $0x2] sm:$0x3] %vm184_vm0, %v169_v7  ;;  %187 = vst.msk [vmem:[#allocation7 + $0x4] sm:$0x3] %vm184_vm0, %v170_v8  ;;  %v172_v16 = vadd.f32 %v223_v13, %v44_v11 }
  0x2d   :  { %v173_v17 = vadd.f32 %v224_v15, %v45_v14  ;;  %v46_v18 = vld [vmem:[#allocation2 + $0xc] sm:$0x3]  ;;  %v225_v19 = vld [vmem:[#allocation5 + $0x6] ss:$0 sm:$0xff]  ;;  %v47_v20 = vld [vmem:[#allocation2 + $0xe] sm:$0x3] }
  0x2e   :  { %188 = vst.msk [vmem:[#allocation7 + $0x6] sm:$0x3] %vm184_vm0, %v171_v12  ;;  %v174_v21 = vadd.f32 %v225_v19, %v46_v18  ;;  %v226_v22 = vld [vmem:[#allocation5 + $0x7] ss:$0 sm:$0xff]  ;;  %v48_v23 = vld [vmem:[#allocation2 + $0x10] sm:$0x3] }
  0x2f   :  { %v227_v24 = vld [vmem:[#allocation5 + $0x8] ss:$0 sm:$0xff]  ;;  %189 = vst.msk [vmem:[#allocation7 + $0x8] sm:$0x3] %vm184_vm0, %v172_v16  ;;  %190 = vst.msk [vmem:[#allocation7 + $0xa] sm:$0x3] %vm184_vm0, %v173_v17  ;;  %v175_v25 = vadd.f32 %v226_v22, %v47_v20 }
  0x30   :  { %v176_v26 = vadd.f32 %v227_v24, %v48_v23  ;;  %v49_v27 = vld [vmem:[#allocation2 + $0x12] sm:$0x3]  ;;  %v228_v28 = vld [vmem:[#allocation5 + $0x9] ss:$0 sm:$0xff]  ;;  %v50_v29 = vld [vmem:[#allocation2 + $0x14] sm:$0x3] }
  0x31   :  { %191 = vst.msk [vmem:[#allocation7 + $0xc] sm:$0x3] %vm184_vm0, %v174_v21  ;;  %v177_v30 = vadd.f32 %v228_v28, %v49_v27  ;;  %v229_v31 = vld [vmem:[#allocation5 + $0xa] ss:$0 sm:$0xff]  ;;  %v51_v32 = vld [vmem:[#allocation2 + $0x16] sm:$0x3] }
  0x32   :  { %v230_v33 = vld [vmem:[#allocation5 + $0xb] ss:$0 sm:$0xff]  ;;  %192 = vst.msk [vmem:[#allocation7 + $0xe] sm:$0x3] %vm184_vm0, %v175_v25  ;;  %193 = vst.msk [vmem:[#allocation7 + $0x10] sm:$0x3] %vm184_vm0, %v176_v26  ;;  %v178_v34 = vadd.f32 %v229_v31, %v50_v29 }
  0x33   :  { %v179_v35 = vadd.f32 %v230_v33, %v51_v32  ;;  %v52_v36 = vld [vmem:[#allocation2 + $0x18] sm:$0x3]  ;;  %v231_v37 = vld [vmem:[#allocation5 + $0xc] ss:$0 sm:$0xff]  ;;  %v53_v38 = vld [vmem:[#allocation2 + $0x1a] sm:$0x3] }
  0x34   :  { %194 = vst.msk [vmem:[#allocation7 + $0x12] sm:$0x3] %vm184_vm0, %v177_v30  ;;  %v180_v39 = vadd.f32 %v231_v37, %v52_v36  ;;  %v232_v40 = vld [vmem:[#allocation5 + $0xd] ss:$0 sm:$0xff]  ;;  %v54_v41 = vld [vmem:[#allocation2 + $0x1c] sm:$0x3] }
  0x35   :  { %v233_v42 = vld [vmem:[#allocation5 + $0xe] ss:$0 sm:$0xff]  ;;  %195 = vst.msk [vmem:[#allocation7 + $0x14] sm:$0x3] %vm184_vm0, %v178_v34  ;;  %196 = vst.msk [vmem:[#allocation7 + $0x16] sm:$0x3] %vm184_vm0, %v179_v35  ;;  %v181_v43 = vadd.f32 %v232_v40, %v53_v38 }
  0x36   :  { %v182_v44 = vadd.f32 %v233_v42, %v54_v41  ;;  %v55_v45 = vld [vmem:[#allocation2 + $0x1e] sm:$0x3]  ;;  %v234_v46 = vld [vmem:[#allocation5 + $0xf] ss:$0 sm:$0xff]  ;;  %197 = vst.msk [vmem:[#allocation7 + $0x18] sm:$0x3] %vm184_vm0, %v180_v39 }
  0x37   :  { %v183_v47 = vadd.f32 %v234_v46, %v55_v45  ;;  %198 = vst.msk [vmem:[#allocation7 + $0x1a] sm:$0x3] %vm184_vm0, %v181_v43  ;;  %s286_s1 = scalar_lea.vmem %s207_s9, 512 }
  0x38   :  { %199 = vst.msk [vmem:[#allocation7 + $0x1c] sm:$0x3] %vm184_vm0, %v182_v44  ;;  %p287_p2 = scmp.ne.s32.totalorder %s207_s9, %s286_s1  ;;  %p292_p4 = scmp.lt.s32.totalorder %s286_s1, %s286_s1 }
  0x39   :  { %200 = vst.msk [vmem:[#allocation7 + $0x1e] sm:$0x3] %vm184_vm0, %v183_v47 }
  0x3a   :  { %p293_p5 = por %p292_p4, %p291_p3 }
  0x3c   :  { %p294_p6 = pnand %p293_p5, %p287_p2 }
  0x3e   :  { %297 = shalt.err (!%p294_p6)
}
  0x3f   :  { %s298_s12 = scalar_lea.hbm %s399_s2, 512 }
  0x40   :  { %p299_p7 = scmp.ne.s32.totalorder %s399_s2, %s298_s12  ;;  %p302_p8 = scmp.lt.u32.totalorder %s298_s12, %s399_s2 }
  0x42   :  { %p304_p9 = pnand %p302_p8, %p299_p7 }
  0x44   :  { %307 = shalt.err (!%p304_p9)
}
  0x45   :  { %212 = dma.vmem_to_hbm [thread:$0]  %s207_s9, 512, %s399_s2, [#allocation4], %s315_s19, %s315_s19, %s316_s20  }
  0x46   :  { %312 = dma.done.wait [#allocation4], 512  }
  0x47   :  { %313 = vsyncadd [#allocation4], 4294966784 }
  0x48   :  { %216 = vsyncpa [#allocation3], 1 }
  0x49   :  { %217 = vsyncpa [#allocation6], 1 }
  0x4a   :  { %218 = vsyncpa [#allocation4], 1 }

</bundles_post_ra>
